<compile_context>
chip_gen: v6e
topology: v6e:2x2x1
jax: 0.10.0
libtpu: 0.0.40
codegen_flags: <defaults>
</compile_context>

<pallas_src>
import functools

import jax
import jax.numpy as jnp
from jax.experimental import pallas as pl
from jax.experimental.pallas import tpu as pltpu


def _round_up(x, m):
    return (x + m - 1) // m * m


# ----------------------------------------------------------------------------
# Pallas kernel: one batch tile of the whole MLP (feature-major layout)
# ----------------------------------------------------------------------------
def _reward_kernel(*refs, ln):
    if ln:
        (x_ref, w1_ref, b1_ref, w2_ref, b2_ref, w3_ref, b3_ref,
         g1_ref, be1_ref, g2_ref, be2_ref, out_ref) = refs
    else:
        (x_ref, w1_ref, b1_ref, w2_ref, b2_ref, w3_ref, b3_ref,
         out_ref) = refs

    x = x_ref[...]                                         # (d_in, tb)

    # fc1 + ReLU: (fc1, d_in) @ (d_in, tb) -> (fc1, tb); batch lane-dense.
    h1 = jnp.dot(w1_ref[...], x, preferred_element_type=jnp.float32) + b1_ref[...]
    h1 = jnp.maximum(h1, 0.0)
    if ln:  # nn.LayerNorm over features (axis 0), eps=1e-5, two-pass stats.
        mu = jnp.mean(h1, axis=0, keepdims=True)
        d = h1 - mu
        var = jnp.mean(d * d, axis=0, keepdims=True)       # >= 0 by construction
        h1 = d * (g1_ref[...] * jax.lax.rsqrt(var + 1e-5)) + be1_ref[...]

    # fc2 + ReLU
    h2 = jnp.dot(w2_ref[...], h1, preferred_element_type=jnp.float32) + b2_ref[...]
    h2 = jnp.maximum(h2, 0.0)
    if ln:
        mu = jnp.mean(h2, axis=0, keepdims=True)
        d = h2 - mu
        var = jnp.mean(d * d, axis=0, keepdims=True)
        h2 = d * (g2_ref[...] * jax.lax.rsqrt(var + 1e-5)) + be2_ref[...]

    # fc3 head (out=1): VPU multiply + sublane reduce; result is lane-dense (1, tb).
    q = jnp.sum(h2 * w3_ref[...], axis=0, keepdims=True) + b3_ref[...]
    out_ref[...] = q.astype(out_ref.dtype)


# ----------------------------------------------------------------------------
# Wrapper: batch-tiled pallas_call
# ----------------------------------------------------------------------------
def reward_network_forward(state, state_, action, params, *, ln=False,
                           batch_tile=4096):
    """Pallas-backed equivalent of RewardNetwork.forward."""
    w1, b1, w2, b2, w3, b3, g1, be1, g2, be2 = params

    state = state.astype(jnp.float32)
    state_ = state_.astype(jnp.float32)
    action = action.astype(jnp.float32)

    batch = state.shape[0]
    obs, obs2, act = state.shape[1], state_.shape[1], action.shape[1]
    d_in = obs + obs2 + act
    fc1 = w1.shape[0]
    fc2 = w2.shape[0]

    # --- batch tiling: batch rides the lane axis -> tile must be a multiple of
    # 128.  Use >= 2 grid steps whenever batch > 128 so dimension_semantics
    # "parallel" can shard across v7x's 2 TensorCores, and size the tile from
    # the step count so padding stays small.
    batch_tile = max(128, _round_up(int(batch_tile), 128))
    n_tiles = max(pl.cdiv(batch, batch_tile), 2 if batch > 128 else 1)
    tb = max(128, _round_up(pl.cdiv(batch, n_tiles), 128))
    padded = _round_up(batch, tb)

    # Pre-pack concat([state, state_, action]) once (single fused XLA pass),
    # feature-major (d_in, padded): one wide DMA + one MXU dot per tile.
    x = jnp.concatenate([state, state_, action], axis=1)       # (batch, d_in)
    if padded != batch:
        x = jnp.pad(x, ((0, padded - batch), (0, 0)))
    xT = x.T                                                    # (d_in, padded)

    weight_inputs = [w1, b1, w2, b2, w3, b3]
    if ln:
        weight_inputs += [g1, be1, g2, be2]

    # Activations: one lane-block of the batch per grid step.
    # Weights/biases: same (only) block every step -> VMEM-resident.
    in_specs = ([pl.BlockSpec((d_in, tb), lambda b: (0, b))]
                + [pl.BlockSpec(w.shape, lambda b: (0, 0)) for w in weight_inputs])
    out_spec = pl.BlockSpec((1, tb), lambda b: (0, b))          # lane-dense stores

    flops = 2 * padded * (d_in * fc1 + fc1 * fc2 + fc2)
    transcendentals = 2 * padded if ln else 0
    bytes_accessed = 4 * (padded * (d_in + 1)
                          + sum(int(w.size) for w in weight_inputs))

    # Explicit scoped-VMEM limit (v5e default is only 16 MiB); stays well under
    # v7x's 64 MiB physical per-TC VMEM.
    vmem_need = 4 * tb * (2 * _round_up(d_in, 8) + 2 * 8 + 3 * (fc1 + fc2)) + (2 << 20)
    vmem_limit = int(min(max(vmem_need, 32 << 20), 48 << 20))

    out = pl.pallas_call(
        functools.partial(_reward_kernel, ln=ln),
        out_shape=jax.ShapeDtypeStruct((1, padded), jnp.float32),
        grid_spec=pltpu.PrefetchScalarGridSpec(
            num_scalar_prefetch=0,
            grid=(padded // tb,),
            in_specs=in_specs,
            out_specs=out_spec,
        ),
        compiler_params=pltpu.CompilerParams(
            dimension_semantics=("parallel",),
            vmem_limit_bytes=vmem_limit),
        cost_estimate=pl.CostEstimate(
            flops=flops,
            transcendentals=transcendentals,
            bytes_accessed=bytes_accessed),
    )(xT, *weight_inputs)

    return out.reshape(padded, 1)[:batch]


# ----------------------------------------------------------------------------
# Deterministic parameter init (matches PyTorch nn.Linear shapes / init ranges)
# Weights stored (out, in); biases / LN params stored as (out, 1) columns.
# ----------------------------------------------------------------------------
def init_reward_params(key, input_dim, n_actions, fc1_dims, fc2_dims):
    d_in = 2 * input_dim + n_actions

    def linear(key, fan_in, fan_out):
        kw, kb = jax.random.split(key)
        bound = 1.0 / (fan_in ** 0.5)
        w = jax.random.uniform(kw, (fan_out, fan_in), jnp.float32, -bound, bound)
        b = jax.random.uniform(kb, (fan_out, 1), jnp.float32, -bound, bound)
        return w, b

    k1, k2, k3 = jax.random.split(key, 3)
    w1, b1 = linear(k1, d_in, fc1_dims)
    w2, b2 = linear(k2, fc1_dims, fc2_dims)
    w3, b3 = linear(k3, fc2_dims, 1)
    w3 = w3.T                                   # store head weight as (fc2, 1)
    # LayerNorm affine params (PyTorch default init: gamma=1, beta=0)
    g1, be1 = jnp.ones((fc1_dims, 1), jnp.float32), jnp.zeros((fc1_dims, 1), jnp.float32)
    g2, be2 = jnp.ones((fc2_dims, 1), jnp.float32), jnp.zeros((fc2_dims, 1), jnp.float32)
    return (w1, b1, w2, b2, w3, b3, g1, be1, g2, be2)


# Pure-JAX reference for a sanity check (high-precision matmuls).
def _ref_forward(state, state_, action, params, ln=False):
    w1, b1, w2, b2, w3, b3, g1, be1, g2, be2 = params
    hp = jax.lax.Precision.HIGHEST
    x = jnp.concatenate([state, state_, action], axis=1)
    h = jnp.maximum(jnp.dot(x, w1.T, precision=hp) + b1.T, 0.0)
    if ln:
        mu = h.mean(-1, keepdims=True)
        v = ((h - mu) ** 2).mean(-1, keepdims=True)
        h = (h - mu) / jnp.sqrt(v + 1e-5) * g1.T + be1.T
    h = jnp.maximum(jnp.dot(h, w2.T, precision=hp) + b2.T, 0.0)
    if ln:
        mu = h.mean(-1, keepdims=True)
        v = ((h - mu) ** 2).mean(-1, keepdims=True)
        h = (h - mu) / jnp.sqrt(v + 1e-5) * g2.T + be2.T
    return jnp.dot(h, w3, precision=hp) + b3


if __name__ == "__main__":
    # Small shapes consistent with the module:
    #   input_dims=(12,), n_actions=4, fc1_dims=32, fc2_dims=32, batch=8
    batch, obs_dim, n_actions, fc1_dims, fc2_dims = 8, 12, 4, 32, 32

    key = jax.random.PRNGKey(0)
    kp, ks, ks2, ka = jax.random.split(key, 4)

    params = init_reward_params(kp, obs_dim, n_actions, fc1_dims, fc2_dims)
    state = jax.random.normal(ks, (batch, obs_dim), jnp.float32)
    state_ = jax.random.normal(ks2, (batch, obs_dim), jnp.float32)
    action = jax.random.uniform(ka, (batch, n_actions), jnp.float32, -1.0, 1.0)

    # ln=False matches the module's default constructor path.
    out = jax.block_until_ready(
        reward_network_forward(state, state_, action, params, ln=False))
    ref = _ref_forward(state, state_, action, params, ln=False)
    assert out.shape == (batch, 1)
    assert jnp.allclose(out, ref, atol=1e-4, rtol=1e-4)

    # LayerNorm (ln=True) variant of the kernel.
    out_ln = jax.block_until_ready(
        reward_network_forward(state, state_, action, params, ln=True))
    ref_ln = _ref_forward(state, state_, action, params, ln=True)
    assert jnp.allclose(out_ln, ref_ln, atol=1e-4, rtol=1e-4)

    # Batch that needs padding + multiple grid steps (pipelining / 2-core split).
    big = 300
    kb1, kb2, kb3 = jax.random.split(jax.random.PRNGKey(1), 3)
    bs = jax.random.normal(kb1, (big, obs_dim), jnp.float32)
    bs_ = jax.random.normal(kb2, (big, obs_dim), jnp.float32)
    ba = jax.random.uniform(kb3, (big, n_actions), jnp.float32, -1.0, 1.0)
    out_big = jax.block_until_ready(
        reward_network_forward(bs, bs_, ba, params, ln=True, batch_tile=128))
    ref_big = _ref_forward(bs, bs_, ba, params, ln=True)
    assert out_big.shape == (big, 1)
    assert jnp.allclose(out_big, ref_big, atol=1e-4, rtol=1e-4)

    print("KERNEL_OK")
</pallas_src>

<mosaic_0001>
module attributes {stable_mosaic.version = 11 : i64} {
  func.func @_reward_kernel(%arg0: i32, %arg1: memref<28x128xf32, #tpu.memory_space<vmem>>, %arg2: memref<32x28xf32, #tpu.memory_space<vmem>>, %arg3: memref<32x1xf32, #tpu.memory_space<vmem>>, %arg4: memref<32x32xf32, #tpu.memory_space<vmem>>, %arg5: memref<32x1xf32, #tpu.memory_space<vmem>>, %arg6: memref<32x1xf32, #tpu.memory_space<vmem>>, %arg7: memref<1x1xf32, #tpu.memory_space<vmem>>, %arg8: memref<1x128xf32, #tpu.memory_space<vmem>>) attributes {dimension_semantics = [#tpu.dimension_semantics<parallel>], iteration_bounds = array<i64: 1>, scalar_prefetch = 0 : i64, scratch_operands = 0 : i64, tpu.core_type = #tpu.core_type<tc>, window_params = [{transform_indices = @transform_0, window_bounds = array<i64: 28, 128>}, {pipeline_mode = #tpu.pipeline_mode<synchronous>, transform_indices = @transform_1, window_bounds = array<i64: 32, 28>}, {pipeline_mode = #tpu.pipeline_mode<synchronous>, transform_indices = @transform_2, window_bounds = array<i64: 32, 1>}, {pipeline_mode = #tpu.pipeline_mode<synchronous>, transform_indices = @transform_3, window_bounds = array<i64: 32, 32>}, {pipeline_mode = #tpu.pipeline_mode<synchronous>, transform_indices = @transform_4, window_bounds = array<i64: 32, 1>}, {pipeline_mode = #tpu.pipeline_mode<synchronous>, transform_indices = @transform_5, window_bounds = array<i64: 32, 1>}, {pipeline_mode = #tpu.pipeline_mode<synchronous>, transform_indices = @transform_6, window_bounds = array<i64: 1, 1>}, {transform_indices = @transform_7, window_bounds = array<i64: 1, 128>}]} {
    %c0 = arith.constant 0 : index
    %c0_0 = arith.constant 0 : index
    %0 = vector.load %arg1[%c0, %c0_0] : memref<28x128xf32, #tpu.memory_space<vmem>>, vector<28x128xf32>
    %c0_1 = arith.constant 0 : index
    %c0_2 = arith.constant 0 : index
    %1 = vector.load %arg2[%c0_1, %c0_2] : memref<32x28xf32, #tpu.memory_space<vmem>>, vector<32x28xf32>
    %cst = arith.constant dense<0.000000e+00> : vector<32x128xf32>
    %2 = tpu.matmul %1, %0, %cst {dimension_numbers = #tpu.dot_dimension_numbers<[1], [0], [0], [1], [0, 0, 1, 1], [], []>} : vector<32x28xf32>, vector<28x128xf32>, vector<32x128xf32> -> vector<32x128xf32>
    %c0_3 = arith.constant 0 : index
    %c0_4 = arith.constant 0 : index
    %3 = vector.load %arg3[%c0_3, %c0_4] : memref<32x1xf32, #tpu.memory_space<vmem>>, vector<32x1xf32>
    %4 = vector.broadcast %3 : vector<32x1xf32> to vector<32x128xf32>
    %5 = arith.addf %2, %4 : vector<32x128xf32>
    %cst_5 = arith.constant 0.000000e+00 : f32
    %6 = vector.broadcast %cst_5 : f32 to vector<32x128xf32>
    %7 = arith.maximumf %5, %6 : vector<32x128xf32>
    %c0_6 = arith.constant 0 : index
    %c0_7 = arith.constant 0 : index
    %8 = vector.load %arg4[%c0_6, %c0_7] : memref<32x32xf32, #tpu.memory_space<vmem>>, vector<32x32xf32>
    %cst_8 = arith.constant dense<0.000000e+00> : vector<32x128xf32>
    %9 = tpu.matmul %8, %7, %cst_8 {dimension_numbers = #tpu.dot_dimension_numbers<[1], [0], [0], [1], [0, 0, 1, 1], [], []>} : vector<32x32xf32>, vector<32x128xf32>, vector<32x128xf32> -> vector<32x128xf32>
    %c0_9 = arith.constant 0 : index
    %c0_10 = arith.constant 0 : index
    %10 = vector.load %arg5[%c0_9, %c0_10] : memref<32x1xf32, #tpu.memory_space<vmem>>, vector<32x1xf32>
    %11 = vector.broadcast %10 : vector<32x1xf32> to vector<32x128xf32>
    %12 = arith.addf %9, %11 : vector<32x128xf32>
    %cst_11 = arith.constant 0.000000e+00 : f32
    %13 = vector.broadcast %cst_11 : f32 to vector<32x128xf32>
    %14 = arith.maximumf %12, %13 : vector<32x128xf32>
    %c0_12 = arith.constant 0 : index
    %c0_13 = arith.constant 0 : index
    %15 = vector.load %arg6[%c0_12, %c0_13] : memref<32x1xf32, #tpu.memory_space<vmem>>, vector<32x1xf32>
    %16 = vector.broadcast %15 : vector<32x1xf32> to vector<32x128xf32>
    %17 = arith.mulf %14, %16 : vector<32x128xf32>
    %cst_14 = arith.constant dense<0.000000e+00> : vector<128xf32>
    %18 = vector.multi_reduction <add>, %17, %cst_14 [0] : vector<32x128xf32> to vector<128xf32>
    %19 = vector.shape_cast %18 : vector<128xf32> to vector<1x128xf32>
    %c0_15 = arith.constant 0 : index
    %c0_16 = arith.constant 0 : index
    %20 = vector.load %arg7[%c0_15, %c0_16] : memref<1x1xf32, #tpu.memory_space<vmem>>, vector<1x1xf32>
    %21 = vector.broadcast %20 : vector<1x1xf32> to vector<1x128xf32>
    %22 = arith.addf %19, %21 : vector<1x128xf32>
    %c0_17 = arith.constant 0 : index
    %c0_18 = arith.constant 0 : index
    %23 = vector.load %arg8[%c0_17, %c0_18] : memref<1x128xf32, #tpu.memory_space<vmem>>, vector<1x128xf32>
    tpu.vector_store %arg8[%c0_17, %c0_18], %22 {strides = array<i32>} : memref<1x128xf32, #tpu.memory_space<vmem>>, vector<1x128xf32>,
    return
  }
  func.func @transform_0(%arg0: i32) -> (i32, i32) {
    %c0_i32 = arith.constant 0 : i32
    %c0_i32_0 = arith.constant 0 : i32
    return %c0_i32, %arg0 : i32, i32
  }
  func.func @transform_1(%arg0: i32) -> (i32, i32) {
    %c0_i32 = arith.constant 0 : i32
    %c0_i32_0 = arith.constant 0 : i32
    %c0_i32_1 = arith.constant 0 : i32
    return %c0_i32, %c0_i32_0 : i32, i32
  }
  func.func @transform_2(%arg0: i32) -> (i32, i32) {
    %c0_i32 = arith.constant 0 : i32
    %c0_i32_0 = arith.constant 0 : i32
    %c0_i32_1 = arith.constant 0 : i32
    return %c0_i32, %c0_i32_0 : i32, i32
  }
  func.func @transform_3(%arg0: i32) -> (i32, i32) {
    %c0_i32 = arith.constant 0 : i32
    %c0_i32_0 = arith.constant 0 : i32
    %c0_i32_1 = arith.constant 0 : i32
    return %c0_i32, %c0_i32_0 : i32, i32
  }
  func.func @transform_4(%arg0: i32) -> (i32, i32) {
    %c0_i32 = arith.constant 0 : i32
    %c0_i32_0 = arith.constant 0 : i32
    %c0_i32_1 = arith.constant 0 : i32
    return %c0_i32, %c0_i32_0 : i32, i32
  }
  func.func @transform_5(%arg0: i32) -> (i32, i32) {
    %c0_i32 = arith.constant 0 : i32
    %c0_i32_0 = arith.constant 0 : i32
    %c0_i32_1 = arith.constant 0 : i32
    return %c0_i32, %c0_i32_0 : i32, i32
  }
  func.func @transform_6(%arg0: i32) -> (i32, i32) {
    %c0_i32 = arith.constant 0 : i32
    %c0_i32_0 = arith.constant 0 : i32
    %c0_i32_1 = arith.constant 0 : i32
    return %c0_i32, %c0_i32_0 : i32, i32
  }
  func.func @transform_7(%arg0: i32) -> (i32, i32) {
    %c0_i32 = arith.constant 0 : i32
    %c0_i32_0 = arith.constant 0 : i32
    return %c0_i32, %arg0 : i32, i32
  }
}

</mosaic_0001>

<bundles_post_ra>
// kernel: tpu_custom_call.1
= control target key start
LH: loop header
LB: loop body
LE: loop exit
PB: predicated region body
PF: predicated region fallthrough
CT: control target
= control target key end

     0   :  { %s567_s0 = inlined_call_operand.vmem [shape: f32[28,128], index: 0, kind: input, shape index: {}]   ;;  %s568_s1 = inlined_call_operand.vmem [shape: f32[32,28], index: 1, kind: input, shape index: {}]   ;;  %s569_s2 = inlined_call_operand.vmem [shape: f32[32,1], index: 2, kind: input, shape index: {}]   ;;  %s570_s3 = inlined_call_operand.vmem [shape: f32[32,32], index: 3, kind: input, shape index: {}]   ;;  %s571_s4 = inlined_call_operand.vmem [shape: f32[32,1], index: 4, kind: input, shape index: {}]   ;;  %s572_s5 = inlined_call_operand.vmem [shape: f32[32,1], index: 5, kind: input, shape index: {}]   ;;  %s573_s6 = inlined_call_operand.<no memory space> [shape: f32[1,1], index: 6, kind: input, shape index: {}]   ;;  %s574_s7 = inlined_call_operand.hbm [shape: f32[1,128], index: 7, kind: output, shape index: {}]  }
   0x1   :  { %v12_v0 = vstv %s573_s6 }
   0x2   :  { %13 = vst [vmem:[#allocation2] sm:$0x1] %v12_v0 }
   0x3   :  { %v32_v1 = vld [vmem:[%s567_s0 + $0x18] sm:$0xf]  ;;  %vm74_vm0 = vcmask 1043456   ;;  %v31_v2 = vld [vmem:[%s567_s0 + $0x10] sm:$0xff]  ;;  %vm61_vm1 = vcmask 228352   ;;  %v33_v3 = vld [vmem:[%s568_s1] sm:$0xff] }
   0x4   :  { %385 = vmatprep.subr.msk.mxu0 %vm74_vm0, %v32_v1  ;;  %v30_v4 = vld [vmem:[%s567_s0 + $0x8] sm:$0xff]  ;;  %393 = vmatprep.mubr.msk.f32.mxu0 %vm61_vm1, %v33_v3  ;;  %v40_v5 = vld [vmem:[%s569_s2 + $0x18] sm:$0xff]  ;;  %v439_v6 = vmov 0   ;;  %v29_v8 = vld [vmem:[%s567_s0] sm:$0xff] }
   0x5   :  { %386 = vmatpush3.msk.msra.mxu0 %vm74_vm0, %v32_v1  ;;  %415 = vset.pattern.permute.xlu0 %v439_v6  ;;  %v38_v7 = vld [vmem:[%s569_s2 + $0x8] sm:$0xff]  ;;  %v39_v9 = vld [vmem:[%s569_s2 + $0x10] sm:$0xff]  ;;  %v37_v12 = vld [vmem:[%s569_s2] sm:$0xff] }
   0x6   :  { %387 = vmatprep.subr.mxu0 %v31_v2  ;;  %58 = vperm.xlu0 %415, %v40_v5   ;;  %v34_v10 = vld [vmem:[%s568_s1 + $0x8] sm:$0xff]  ;;  %v35_v11 = vld [vmem:[%s568_s1 + $0x10] sm:$0xff] }
   0x7   :  { %388 = vmatpush3.msra.mxu0 %v31_v2  ;;  %416 = vset.pattern.permute.xlu1 %v439_v6 }
   0x8   :  { %389 = vmatprep.subr.mxu0 %v30_v4  ;;  %48 = vperm.xlu1 %416, %v38_v7  }
   0x9   :  { %390 = vmatpush3.msra.mxu0 %v30_v4 }
   0xa   :  { %391 = vmatprep.subr.mxu0 %v29_v8 }
   0xb   :  { %14 = vsyncpa [#allocation4], 0  ;;  %392 = vmatpush3.msra.mxu0 %v29_v8  ;;  %53 = vperm.xlu0 %415, %v39_v9   ;;  %v171_v13 = vld [vmem:[%s571_s4] sm:$0xff]  ;;  %v36_v14 = vld [vmem:[%s568_s1 + $0x18] sm:$0xff]  ;;  %vm195_vm2 = vcmask 261120   ;;  %v340_v5 = vlaneseq }
   0xc   :  { %394 = vmatmul.mubr.msk.f32.vlgmr.msra.gmra.mxu0 %vm61_vm1, %v34_v10  ;;  %43 = vperm.xlu1 %416, %v37_v12   ;;  %v172_v15 = vld [vmem:[%s571_s4 + $0x8] sm:$0xff]  ;;  %v173_v16 = vld [vmem:[%s571_s4 + $0x10] sm:$0xff]  ;;  %v174_v17 = vld [vmem:[%s571_s4 + $0x18] sm:$0xff] }
   0xd   :  { %396 = vmatprep.mubr.msk.f32.mxu0 %vm61_vm1, %v35_v11  ;;  %v297_v18 = vld [vmem:[%s572_s5] sm:$0xff]  ;;  %v298_v19 = vld [vmem:[%s572_s5 + $0x8] sm:$0xff]  ;;  %v299_v20 = vld [vmem:[%s572_s5 + $0x10] sm:$0xff]  ;;  %v341_v8 = vshrl.u32 %v340_v5, 7 }
   0xe   :  { %v300_v21 = vld [vmem:[%s572_s5 + $0x18] sm:$0xff]  ;;  %v334_v22 = vld [vmem:[#allocation2] sm:$0x1]  ;;  %v168_v40 = vld [vmem:[%s570_s3 + $0x8] sm:$0xff] }
   0xf   :  { %177 = vperm.xlu0 %415, %v171_v13   ;;  %v167_v23 = vld [vmem:[%s570_s3] sm:$0xff]  ;;  %v169_v41 = vld [vmem:[%s570_s3 + $0x10] sm:$0xff]  ;;  %v170_v42 = vld [vmem:[%s570_s3 + $0x18] sm:$0xff]  ;;  %v342_v11 = vsub.s32 0, %v341_v8  ;;  %s440_s3 = smov [#allocation3]  }
  0x10   :  { %397 = vmatmul.mubr.msk.f32.gmra.mxu0 %vm61_vm1, %v36_v14  ;;  %182 = vperm.xlu1 %416, %v172_v15   ;;  %s352_s21 = sshll.u32 %s440_s3, 4  ;;  %s353_s21 = int_to_ptr.vmem [resolvable:$true] %s352_s21 }
  0x11   :  { %407 = vmatprep.mubr.msk.f32.mxu1 %vm195_vm2, %v167_v23  ;;  %s417_s22 = scalar_lea.vmem %s353_s21, 16  ;;  %s421_s0 = scalar_lea.vmem %s353_s21, 32 }
  0x12   :  { %p418_p0 = scmp.ne.s32.totalorder %s353_s21, %s417_s22  ;;  %p422_p1 = scmp.lt.s32.totalorder %s353_s21, %s353_s21 }
  0x13   :  { %187 = vperm.xlu0 %415, %v173_v16   ;;  %p423_p2 = scmp.lt.s32.totalorder %s421_s0, %s417_s22 }
  0x14   :  { %192 = vperm.xlu1 %416, %v174_v17  }
  0x15   :  { %p424_p3 = por %p423_p2, %p422_p1 }
  0x17   :  { %303 = vperm.xlu0 %415, %v297_v18   ;;  %p425_p4 = pnand %p424_p3, %p418_p0 }
  0x18   :  { %308 = vperm.xlu1 %416, %v298_v19  }
  0x1b   :  { %313 = vperm.xlu0 %415, %v299_v20  }
  0x1c   :  { %318 = vperm.xlu1 %416, %v300_v21  }
  0x1f   :  { %337 = vperm.xlu0 %415, %v334_v22  }
  0x81   :  { %v59_v24 = vpop.permute.xlu0 %58 }
  0x83   :  { %v49_v26 = vpop.permute.xlu1 %48 }
  0x86   :  { %v54_v30 = vpop.permute.xlu0 %53 }
  0x87   :  { %v44_v35 = vpop.permute.xlu1 %43 }
  0x8a   :  { %v178_v43 = vpop.permute.xlu0 %177 }
  0x8b   :  { %v183_v44 = vpop.permute.xlu1 %182 }
  0x8e   :  { %v188_v45 = vpop.permute.xlu0 %187 }
  0x8f   :  { %v193_v46 = vpop.permute.xlu1 %192 }
  0x92   :  { %v304_v51 = vpop.permute.xlu0 %303 }
  0x93   :  { %v309_v56 = vpop.permute.xlu1 %308 }
  0x96   :  { %v314_v63 = vpop.permute.xlu0 %313 }
  0x97   :  { %v319_v2 = vpop.permute.xlu1 %318 }
  0x9a   :  { %v338_v13 = vpop.permute.xlu0 %337 }
  0x9b   :  { %v343_v15 = vrot.slane %v338_v13, %v342_v11 }
  0xcc   :  { %v395_v25 = vpop.f32.mrf.mxu0 }
  0xcd   :  { %v150_v32 = vadd.f32 %v395_v25, %v49_v26 }
  0xce   :  { %v144_v27 = vpop.f32.mrf.mxu0 }
  0xcf   :  { %v145_v36 = vadd.f32 %v144_v27, %v44_v35  ;;  %v164_v38 = vmax.f32 %v150_v32, 0.0 }
  0xd0   :  { %v398_v28 = vpop.f32.mrf.mxu0 }
  0xd1   :  { %v160_v29 = vadd.f32 %v398_v28, %v59_v24  ;;  %v163_v39 = vmax.f32 %v145_v36, 0.0 }
  0xd2   :  { %v154_v31 = vpop.f32.mrf.mxu0 }
  0xd3   :  { %v166_v33 = vmax.f32 %v160_v29, 0.0  ;;  %v155_v34 = vadd.f32 %v154_v31, %v54_v30 }
  0xd5   :  { %v165_v37 = vmax.f32 %v155_v34, 0.0  ;;  %399 = vmatprep.subr.mxu1 %v166_v33 }
  0xd6   :  { %400 = vmatpush3.msra.mxu1 %v166_v33 }
  0xd7   :  { %401 = vmatprep.subr.mxu1 %v165_v37 }
  0xd8   :  { %402 = vmatpush3.msra.mxu1 %v165_v37 }
  0xd9   :  { %403 = vmatprep.subr.mxu1 %v164_v38 }
  0xda   :  { %404 = vmatpush3.msra.mxu1 %v164_v38 }
  0xdb   :  { %405 = vmatprep.subr.mxu1 %v163_v39 }
  0xdc   :  { %406 = vmatpush3.msra.mxu1 %v163_v39 }
  0xdd   :  { %408 = vmatmul.mubr.msk.f32.vlgmr.msra.gmra.mxu1 %vm195_vm2, %v168_v40 }
  0xde   :  { %410 = vmatprep.mubr.msk.f32.mxu1 %vm195_vm2, %v169_v41 }
  0xe1   :  { %411 = vmatmul.mubr.msk.f32.gmra.mxu1 %vm195_vm2, %v170_v42 }
 0x19d   :  { %v409_v47 = vpop.f32.mrf.mxu1 }
 0x19e   :  { %v280_v48 = vadd.f32 %v409_v47, %v183_v44 }
 0x19f   :  { %v274_v49 = vpop.f32.mrf.mxu1 }
 0x1a0   :  { %v275_v50 = vadd.f32 %v274_v49, %v178_v43  ;;  %v294_v53 = vmax.f32 %v280_v48, 0.0 }
 0x1a1   :  { %v412_v52 = vpop.f32.mrf.mxu1 }
 0x1a2   :  { %v293_v54 = vmax.f32 %v275_v50, 0.0  ;;  %v290_v55 = vadd.f32 %v412_v52, %v193_v46  ;;  %v322_v60 = vmul.f32 %v309_v56, %v294_v53 }
 0x1a3   :  { %v284_v57 = vpop.f32.mrf.mxu1 }
 0x1a4   :  { %v321_v58 = vmul.f32 %v304_v51, %v293_v54  ;;  %v285_v59 = vadd.f32 %v284_v57, %v188_v45  ;;  %v296_v61 = vmax.f32 %v290_v55, 0.0 }
 0x1a6   :  { %v295_v62 = vmax.f32 %v285_v59, 0.0  ;;  %v325_v0 = vadd.f32 %v322_v60, %v321_v58  ;;  %v324_v3 = vmul.f32 %v319_v2, %v296_v61 }
 0x1a8   :  { %v323_v1 = vmul.f32 %v314_v63, %v295_v62 }
 0x1aa   :  { %v326_v4 = vadd.f32 %v325_v0, %v323_v1 }
 0x1ac   :  { %v327_v6 = vadd.f32 %v326_v4, %v324_v3 }
 0x1ae   :  { %v328_v7 = vrot.slane %v327_v6, 4 }
 0x1b0   :  { %v329_v9 = vadd.f32 %v328_v7, %v327_v6 }
 0x1b2   :  { %v330_v10 = vrot.slane %v329_v9, 2 }
 0x1b4   :  { %v331_v12 = vadd.f32 %v330_v10, %v329_v9 }
 0x1b6   :  { %v332_v14 = vrot.slane %v331_v12, 1 }
 0x1b8   :  { %v333_v16 = vadd.f32 %v332_v14, %v331_v12 }
 0x1ba   :  { %v344_v17 = vadd.f32 %v343_v15, %v333_v16 }
 0x1bc   :  { %345 = vst [vmem:[#allocation3] sm:$0x1] %v344_v17 }
 0x1bd   :  { %428 = shalt.err (!%p425_p4)
}
 0x1be   :  { %355 = dma.vmem_to_hbm [thread:$0]  %s353_s21, 16, %s574_s7, [#allocation4]  }
 0x1bf   :  { %437 = dma.done.wait [#allocation4], 16  }
 0x1c0   :  { %438 = vsyncadd [#allocation4], 4294967280 }
 0x1c1   :  { %359 = vsyncpa [#allocation4], 1 }

</bundles_post_ra>
